<compile_context>
chip_gen: v6e
topology: v6e:2x2x1
jax: 0.10.0
libtpu: 0.0.40
codegen_flags: <defaults>
</compile_context>

<pallas_src>
import jax
import jax.numpy as jnp
from jax.experimental import pallas as pl
from jax.experimental.pallas import tpu as pltpu


_LANE_CANDIDATES = (2048, 1024, 512, 256, 128)  # widest divisor of x.size wins
_FALLBACK_LANES = 512                            # used only when padding is unavoidable
_ROW_ALIGN = 32                                  # int8 mask packing tile is (32, 128)
_TARGET_TILE_ELEMS = 2048 * 512                  # ~4 MiB of f32 per operand per buffer
_SMALL_FASTPATH_BYTES = 1 << 20                  # below this, fused XLA elementwise wins
_VMEM_LIMIT_BYTES = 32 << 20                     # covers v5e's 16 MiB default scoped VMEM


def _sparse_apply_kernel(x_ref, m_ref, o_ref):
    """Elementwise sparse apply: o = x * mask (mask cast on the VPU in-kernel)."""
    o_ref[...] = x_ref[...] * m_ref[...].astype(x_ref.dtype)


def _round_up(n: int, m: int) -> int:
    return ((n + m - 1) // m) * m


def _choose_lanes(total: int) -> int:
    """Widest lane count that divides the element count (=> zero padding)."""
    for lanes in _LANE_CANDIDATES:
        if total % lanes == 0:
            return lanes
    return _FALLBACK_LANES


def _choose_tile_rows(rows: int, lanes: int) -> int:
    """Tile height: big enough to amortize per-step overhead, >=2 blocks when possible."""
    # ~4 MiB f32 per operand per buffer amortizes the ~0.35 us per-grid-step overhead
    # while keeping the double-buffered working set (~19 MiB) inside scoped VMEM on
    # v5e (with raised limit), v6e, and v7x (64 MiB/TC physical).
    target = max(_ROW_ALIGN, ((_TARGET_TILE_ELEMS // lanes) // _ROW_ALIGN) * _ROW_ALIGN)
    if rows <= 2 * _ROW_ALIGN:
        # Single full-height block: block dim == array dim is always legal.
        return rows
    # Guarantee at least 2 grid blocks so the "parallel" axis can feed both
    # TensorCores on v7x for mid-size tensors.
    two_blocks = _round_up(pl.cdiv(rows, 2), _ROW_ALIGN)
    return min(target, two_blocks)


def _prep_mask(mask: jax.Array) -> jax.Array:
    """Keep the mask as narrow as possible without changing semantics.

    The sparser is expected to supply an int8/bool {0,1} mask (build_mask below
    does) so it streams at 1 B/elem with no per-call conversion in the hot path.
    A floating ("soft") mask is kept in its native dtype — NOT truncated — so
    y == x * mask exactly.
    """
    if mask.dtype == jnp.int8:
        return mask
    if jnp.issubdtype(mask.dtype, jnp.floating):
        return mask
    # bool / wider integer binary masks: narrow to 1 B/elem (one-time convert).
    return mask.astype(jnp.int8)


def sparse_opr_forward(x: jax.Array, mask: jax.Array, *,
                       min_pallas_bytes: int = _SMALL_FASTPATH_BYTES,
                       in_place: bool = False) -> jax.Array:
    """y = x * mask via a tiled, software-pipelined Pallas TPU kernel."""
    assert x.shape == mask.shape, (x.shape, mask.shape)
    orig_shape = x.shape
    total = x.size

    mask = _prep_mask(mask)

    # Small-tensor fast path: kernel launch + pipeline prologue/epilogue dominate
    # below ~1 MiB; plain fused XLA elementwise is faster there.
    if total * x.dtype.itemsize < min_pallas_bytes:
        return x * mask.astype(x.dtype)

    # Lane-dense 2-D slab.  Prefer a lane width that divides the element count so
    # no pad / output-slice HBM passes are needed (the common case for NN
    # activation shapes); otherwise fall back to padding to a 512 multiple.
    lanes = _choose_lanes(total)
    pad = 0
    if total % lanes:
        lanes = _FALLBACK_LANES
        pad = _round_up(total, lanes) - total

    if pad:
        # TODO(synk): this fallback costs one extra HBM pass over x/mask/out; it
        # only triggers when x.size is not a multiple of 128.
        x_flat = jnp.pad(x.reshape(-1), (0, pad))
        m_flat = jnp.pad(mask.reshape(-1), (0, pad))
    else:
        x_flat = x.reshape(-1)      # free: contiguous reshape
        m_flat = mask.reshape(-1)

    rows = (total + pad) // lanes
    x2d = x_flat.reshape(rows, lanes)
    m2d = m_flat.reshape(rows, lanes)

    tile_rows = _choose_tile_rows(rows, lanes)
    grid = (pl.cdiv(rows, tile_rows),)   # ragged final row-block handled by Pallas

    bytes_per_elem = 2 * x.dtype.itemsize + m2d.dtype.itemsize
    cost = pl.CostEstimate(flops=total, transcendentals=0,
                           bytes_accessed=total * bytes_per_elem)

    out2d = pl.pallas_call(
        _sparse_apply_kernel,
        out_shape=jax.ShapeDtypeStruct((rows, lanes), x.dtype),
        grid=grid,
        in_specs=[
            pl.BlockSpec((tile_rows, lanes), lambda i: (i, 0)),
            pl.BlockSpec((tile_rows, lanes), lambda i: (i, 0)),
        ],
        out_specs=pl.BlockSpec((tile_rows, lanes), lambda i: (i, 0)),
        compiler_params=pltpu.CompilerParams(
            dimension_semantics=("parallel",),    # shards grid across TCs on v7x
            vmem_limit_bytes=_VMEM_LIMIT_BYTES,   # v5e default scoped VMEM is 16 MiB
        ),
        cost_estimate=cost,
        input_output_aliases=({0: 0} if in_place else {}),
    )(x2d, m2d)

    out_flat = out2d.reshape(-1)
    if pad:
        out_flat = out_flat[:total]
    return out_flat.reshape(orig_shape)


def build_mask(shape, sparsity=0.5, key=None):
    """Deterministic synthetic binary mask (stands in for sparser.build_mask).

    Returned as int8 {0,1} so the mask streams at 1 B/elem and the hot path
    never pays a per-call dtype-conversion HBM pass.
    """
    if key is None:
        key = jax.random.PRNGKey(42)
    u = jax.random.uniform(key, shape, dtype=jnp.float32)
    return (u >= sparsity).astype(jnp.int8)


if __name__ == "__main__":
    key = jax.random.PRNGKey(0)
    kx, km = jax.random.split(key)

    # Small NCHW input consistent with a conv-style sparse operator.
    B, C, H, W = 2, 4, 16, 16
    x = jax.random.normal(kx, (B, C, H, W), dtype=jnp.float32)
    mask = build_mask((B, C, H, W), sparsity=0.5, key=km)

    # Pure-JAX reference of the sparse apply.
    ref = x * mask.astype(x.dtype)

    # Force the Pallas path even at this small demo size.
    y = sparse_opr_forward(x, mask, min_pallas_bytes=0)
    y = jax.block_until_ready(y)
    assert y.shape == (B, C, H, W)
    assert jnp.array_equal(y, ref)

    # Default call exercises the small-tensor fast path (same result).
    y_fast = jax.block_until_ready(sparse_opr_forward(x, mask))
    assert jnp.array_equal(y_fast, ref)

    print("KERNEL_OK")
</pallas_src>

<mosaic_0001>
module attributes {stable_mosaic.version = 11 : i64} {
  func.func @_sparse_apply_kernel(%arg0: i32, %arg1: memref<1x2048xf32, #tpu.memory_space<vmem>>, %arg2: memref<1x2048xi8, #tpu.memory_space<vmem>>, %arg3: memref<1x2048xf32, #tpu.memory_space<vmem>>) attributes {dimension_semantics = [#tpu.dimension_semantics<parallel>], iteration_bounds = array<i64: 1>, scalar_prefetch = 0 : i64, scratch_operands = 0 : i64, tpu.core_type = #tpu.core_type<tc>, window_params = [{transform_indices = @transform_0, window_bounds = array<i64: 1, 2048>}, {transform_indices = @transform_1, window_bounds = array<i64: 1, 2048>}, {transform_indices = @transform_2, window_bounds = array<i64: 1, 2048>}]} {
    %c0 = arith.constant 0 : index
    %c0_0 = arith.constant 0 : index
    %0 = vector.load %arg1[%c0, %c0_0] : memref<1x2048xf32, #tpu.memory_space<vmem>>, vector<1x2048xf32>
    %c0_1 = arith.constant 0 : index
    %c0_2 = arith.constant 0 : index
    %1 = vector.load %arg2[%c0_1, %c0_2] : memref<1x2048xi8, #tpu.memory_space<vmem>>, vector<1x2048xi8>
    %2 = arith.sitofp %1 : vector<1x2048xi8> to vector<1x2048xf32>
    %3 = arith.mulf %0, %2 : vector<1x2048xf32>
    %c0_3 = arith.constant 0 : index
    %c0_4 = arith.constant 0 : index
    %4 = vector.load %arg3[%c0_3, %c0_4] : memref<1x2048xf32, #tpu.memory_space<vmem>>, vector<1x2048xf32>
    tpu.vector_store %arg3[%c0_3, %c0_4], %3 {strides = array<i32>} : memref<1x2048xf32, #tpu.memory_space<vmem>>, vector<1x2048xf32>,
    return
  }
  func.func @transform_0(%arg0: i32) -> (i32, i32) {
    %c0_i32 = arith.constant 0 : i32
    %c0_i32_0 = arith.constant 0 : i32
    return %arg0, %c0_i32 : i32, i32
  }
  func.func @transform_1(%arg0: i32) -> (i32, i32) {
    %c0_i32 = arith.constant 0 : i32
    %c0_i32_0 = arith.constant 0 : i32
    return %arg0, %c0_i32 : i32, i32
  }
  func.func @transform_2(%arg0: i32) -> (i32, i32) {
    %c0_i32 = arith.constant 0 : i32
    %c0_i32_0 = arith.constant 0 : i32
    return %arg0, %c0_i32 : i32, i32
  }
}

</mosaic_0001>

<bundles_post_ra>
// kernel: tpu_custom_call.1
= control target key start
LH: loop header
LB: loop body
LE: loop exit
PB: predicated region body
PF: predicated region fallthrough
CT: control target
= control target key end

     0   :  { %7 = vsyncpa [#allocation3], 0  ;;  %s274_s0 = inlined_call_operand.hbm [shape: f32[1,2048], index: 0, kind: input, shape index: {}]   ;;  %s275_s1 = inlined_call_operand.hbm [shape: s8[1,2048], index: 1, kind: input, shape index: {}]   ;;  %s276_s2 = inlined_call_operand.hbm [shape: f32[1,2048], index: 2, kind: output, shape index: {}]  }
   0x1   :  { %8 = vsyncpa [#allocation6], 0 }
   0x2   :  { %9 = vsyncpa [#allocation4], 0  ;;  %s246_s9 = smov [#allocation2]   ;;  %s247_s11 = smov [#allocation5]  }
   0x3   :  { %s16_s10 = sshll.u32 %s246_s9, 4  ;;  %s26_s12 = sshll.u32 %s247_s11, 4  ;;  %s17_s10 = int_to_ptr.vmem [resolvable:$true] %s16_s10  ;;  %s27_s12 = int_to_ptr.vmem [resolvable:$true] %s26_s12 }
   0x4   :  { %s188_s13 = scalar_lea.vmem %s17_s10, 256  ;;  %p193_p1 = scmp.lt.s32.totalorder %s17_s10, %s17_s10 }
   0x5   :  { %p189_p0 = scmp.ne.s32.totalorder %s17_s10, %s188_s13  ;;  %p194_p2 = scmp.lt.s32.totalorder %s188_s13, %s188_s13 }
   0x7   :  { %p195_p3 = por %p194_p2, %p193_p1 }
   0x9   :  { %p196_p4 = pnand %p195_p3, %p189_p0 }
   0xb   :  { %199 = shalt.err (!%p196_p4)
}
   0xc   :  { %19 = dma.hbm_to_vmem [thread:$0]  %s274_s0, 256, %s17_s10, [#allocation3]  }
   0xd   :  { %s208_s16 = scalar_lea.vmem %s27_s12, 256  ;;  %p213_p6 = scmp.lt.s32.totalorder %s27_s12, %s27_s12 }
   0xe   :  { %p209_p5 = scmp.ne.s32.totalorder %s27_s12, %s208_s16  ;;  %p214_p7 = scmp.lt.s32.totalorder %s208_s16, %s208_s16 }
  0x10   :  { %p215_p8 = por %p214_p7, %p213_p6 }
  0x12   :  { %p216_p9 = pnand %p215_p8, %p209_p5 }
  0x14   :  { %219 = shalt.err (!%p216_p9)
}
  0x15   :  { %29 = dma.hbm_to_vmem [thread:$0]  %s275_s1, 256, %s27_s12, [#allocation6]  }
  0x16   :  { %240 = dma.done.wait [#allocation3], 256  }
  0x17   :  { %241 = vsyncadd [#allocation3], 4294967040 }
  0x18   :  { %242 = dma.done.wait [#allocation6], 256  }
  0x19   :  { %243 = vsyncadd [#allocation6], 4294967040  ;;  %v67_v0 = vlaneseq  ;;  %v248_v1 = vmov 1966171168   ;;  %v38_v5 = vld [vmem:[#allocation5] sm:$0xff]  ;;  %v39_v11 = vld [vmem:[#allocation5 + $0x8] sm:$0xff] }
  0x1a   :  { %v65_v2 = vunpack.c.l.s4 %v248_v1  ;;  %v40_v7 = vunpack.c.0.s8 %v38_v5  ;;  %v41_v8 = vunpack.c.1.s8 %v38_v5  ;;  %v42_v9 = vunpack.c.2.s8 %v38_v5  ;;  %v36_v38 = vld [vmem:[#allocation2] sm:$0xff]  ;;  %v37_v42 = vld [vmem:[#allocation2 + $0x8] sm:$0xff]  ;;  %s249_s0 = smov [#allocation7]  }
  0x1b   :  { %v68_v4 = vshrl.u32 %v67_v0, 7  ;;  %v43_v10 = vunpack.c.3.s8 %v38_v5  ;;  %v44_v12 = vunpack.c.0.s8 %v39_v11  ;;  %v45_v13 = vunpack.c.1.s8 %v39_v11  ;;  %s166_s1 = sshll.u32 %s249_s0, 4  ;;  %s167_s1 = int_to_ptr.vmem [resolvable:$true] %s166_s1 }
  0x1c   :  { %v66_v3 = vunpack.c.0.s8 %v65_v2  ;;  %v46_v14 = vunpack.c.2.s8 %v39_v11  ;;  %v47_v15 = vunpack.c.3.s8 %v39_v11  ;;  %v48_v16 = vcvt.s32.f32 %v40_v7  ;;  %s220_s19 = scalar_lea.vmem %s167_s1, 256  ;;  %p225_p11 = scmp.lt.s32.totalorder %s167_s1, %s167_s1 }
  0x1d   :  { %v49_v17 = vcvt.s32.f32 %v41_v8  ;;  %v50_v18 = vcvt.s32.f32 %v42_v9  ;;  %v51_v19 = vcvt.s32.f32 %v43_v10  ;;  %v52_v20 = vcvt.s32.f32 %v44_v12  ;;  %p221_p10 = scmp.ne.s32.totalorder %s167_s1, %s220_s19  ;;  %p226_p12 = scmp.lt.s32.totalorder %s220_s19, %s220_s19 }
  0x1e   :  { %v69_v6 = vsub.s32 %v66_v3, %v68_v4  ;;  %v53_v21 = vcvt.s32.f32 %v45_v13  ;;  %v54_v22 = vcvt.s32.f32 %v46_v14  ;;  %v55_v23 = vcvt.s32.f32 %v47_v15 }
  0x1f   :  { %p227_p13 = por %p226_p12, %p225_p11 }
  0x20   :  { %v70_v24 = vrot.slane %v48_v16, %v69_v6  ;;  %v77_v25 = vrot.slane %v49_v17, %v69_v6  ;;  %v84_v26 = vrot.slane %v50_v18, %v69_v6  ;;  %v91_v27 = vrot.slane %v51_v19, %v69_v6 }
  0x21   :  { %v115_v28 = vrot.slane %v52_v20, %v69_v6  ;;  %v122_v29 = vrot.slane %v53_v21, %v69_v6  ;;  %v129_v30 = vrot.slane %v54_v22, %v69_v6  ;;  %v136_v31 = vrot.slane %v55_v23, %v69_v6  ;;  %p228_p0 = pnand %p227_p13, %p221_p10 }
  0x22   :  { %v92_v32 = vcombine.low %v70_v24, %v77_v25  ;;  %v93_v33 = vcombine.low %v84_v26, %v91_v27 }
  0x23   :  { %v137_v34 = vcombine.low %v115_v28, %v122_v29  ;;  %v138_v35 = vcombine.low %v129_v30, %v136_v31 }
  0x24   :  { %v100_v36 = vrot.slane %v92_v32, %v69_v6  ;;  %v107_v37 = vrot.slane %v93_v33, %v69_v6 }
  0x25   :  { %v145_v39 = vrot.slane %v137_v34, %v69_v6  ;;  %v152_v40 = vrot.slane %v138_v35, %v69_v6 }
  0x26   :  { %v108_v41 = vcombine.low %v100_v36, %v107_v37 }
  0x27   :  { %v153_v43 = vcombine.low %v145_v39, %v152_v40 }
  0x28   :  { %v156_v44 = vmul.f32 %v108_v41, %v36_v38 }
  0x29   :  { %v157_v45 = vmul.f32 %v153_v43, %v37_v42 }
  0x2a   :  { %158 = vst [vmem:[#allocation7] sm:$0xff] %v156_v44 }
  0x2b   :  { %159 = vst [vmem:[#allocation7 + $0x8] sm:$0xff] %v157_v45 }
  0x2c   :  { %231 = shalt.err (!%p228_p0)
}
  0x2d   :  { %169 = dma.vmem_to_hbm [thread:$0]  %s167_s1, 256, %s276_s2, [#allocation4]  }
  0x2e   :  { %244 = dma.done.wait [#allocation4], 256  }
  0x2f   :  { %245 = vsyncadd [#allocation4], 4294967040 }
  0x30   :  { %173 = vsyncpa [#allocation3], 1 }
  0x31   :  { %174 = vsyncpa [#allocation6], 1 }
  0x32   :  { %175 = vsyncpa [#allocation4], 1 }

</bundles_post_ra>
